<compile_context>
chip_gen: v7x
topology: tpu7x:2x2x1
jax: 0.10.0
libtpu: 0.0.40
codegen_flags: <defaults>
</compile_context>

<pallas_src>
import functools

import jax
import jax.numpy as jnp
from jax import lax
from jax.experimental import pallas as pl
from jax.experimental.pallas import tpu as pltpu

_EPS2 = 1e-24  # (1e-12)^2 : torch.nn.functional.normalize clamps the *norm* at 1e-12.
_NEG_BIG = -1e30  # finite "minus infinity" used to exclude masked score entries.


def _mpn_loss_kernel(a_ref, c_ref, out_ref,
                     a_f32_ref, a_mm_ref, m_ref, l_ref, diag_ref, *,
                     scale, pos_count, batch_size, tile_cols, chunk_cols, mxu_bf16):
    t = pl.program_id(0)
    B = batch_size
    mm_dtype = jnp.bfloat16 if mxu_bf16 else jnp.float32
    num_chunks = tile_cols // chunk_cols

    @pl.when(t == 0)
    def _init():
        a = a_ref[...].astype(jnp.float32)                                  # (B, D)
        inv = lax.rsqrt(jnp.maximum(jnp.sum(a * a, axis=-1, keepdims=True), _EPS2))
        a_n = a * (inv * scale)                 # fold softmax `scale` into the anchors
        a_f32_ref[...] = a_n                    # f32 copy: feeds the diagonal dot
        a_mm_ref[...] = a_n.astype(mm_dtype)    # MXU copy (bf16 on v6e/v7x), cached once
        # With pos_count > 1 the reference masks with 0 (not -inf); start the running
        # max at 0 so exp(0 - m) <= 1 at finalize.  The positive diagonals are folded
        # into the max below, so exp(d_i - m) <= 1 as well.
        m_init = 0.0 if pos_count > 1 else -jnp.inf
        m_ref[...] = jnp.full(m_ref.shape, m_init, jnp.float32)
        l_ref[...] = jnp.zeros(l_ref.shape, jnp.float32)
        diag_ref[...] = jnp.zeros(diag_ref.shape, jnp.float32)

    a_f32 = a_f32_ref[...]                                                  # (B, D) f32
    a_mm = a_mm_ref[...]                                                    # (B, D) mm

    # Static, unrolled loop over compute chunks of the DMA tile: keeps the lane
    # width of scores / exp intermediates bounded (<= chunk_cols) regardless of
    # how large the DMA tile is.
    for ci in range(num_chunks):
        c0 = ci * chunk_cols
        c = c_ref[pl.ds(c0, chunk_cols), :].astype(jnp.float32)             # (cn, D) f32
        inv_c = lax.rsqrt(jnp.maximum(jnp.sum(c * c, axis=-1, keepdims=True), _EPS2))
        c_n = c * inv_c
        c_mm = c_n.astype(mm_dtype)

        # scores[r, col] = scale * <a_n[r], cand_n[tile col]>               -> (B, cn)
        scores = lax.dot_general(
            a_mm, c_mm, dimension_numbers=(((1,), (1,)), ((), ())),
            preferred_element_type=jnp.float32)

        # Positive blocks whose rows live in this (statically known) chunk.
        # tile_cols % B == 0 and chunk_cols % B == 0, so every positive block sits
        # entirely inside one chunk of one tile; offsets below are Python-static.
        pos_here = []
        for j in range(1, pos_count + 1):
            g_row = (j - 1) * B
            tile_of_j = g_row // tile_cols
            off_in_tile = g_row - tile_of_j * tile_cols
            if off_in_tile // chunk_cols == ci:
                pos_here.append((j, tile_of_j, off_in_tile - ci * chunk_cols))

        extra_max = None
        if pos_here:
            col_ids = lax.broadcasted_iota(jnp.int32, (B, chunk_cols), 1)
            row_ids = lax.broadcasted_iota(jnp.int32, (B, chunk_cols), 0)
            for (j, tile_j, row0) in pos_here:
                is_here = t == tile_j
                # f32 diagonal (VPU dot), independent of the MXU operand dtype.
                d_j = jnp.sum(a_f32 * c_n[row0:row0 + B, :], axis=-1, keepdims=True)

                @pl.when(is_here)
                def _store_diag(j=j, d_j=d_j):
                    diag_ref[:, j - 1:j] = d_j

                # Online exclusion: drop this positive's diagonal from the running
                # sum; it is re-added algebraically per-positive at finalize.
                dmask = jnp.logical_and(col_ids == row_ids + row0, is_here)
                scores = jnp.where(dmask, jnp.float32(_NEG_BIG), scores)
                d_fold = jnp.where(is_here, d_j, -jnp.inf)
                extra_max = d_fold if extra_max is None else jnp.maximum(extra_max, d_fold)

        s_max = jnp.max(scores, axis=-1, keepdims=True)                     # (B, 1)
        if extra_max is not None:
            s_max = jnp.maximum(s_max, extra_max)
        m_prev = m_ref[...]
        m_new = jnp.maximum(m_prev, s_max)
        alpha = jnp.exp(m_prev - m_new)
        l_ref[...] = alpha * l_ref[...] + jnp.sum(jnp.exp(scores - m_new),
                                                  axis=-1, keepdims=True)
        m_ref[...] = m_new

    @pl.when(t == pl.num_programs(0) - 1)
    def _finalize():
        m = m_ref[...]                                                      # (B, 1)
        l_masked = l_ref[...]           # sum(exp(score - m)) over NON-diagonal columns
        d = diag_ref[...]                                                   # (B, P)
        e_d = jnp.exp(d - m)            # <= 1: the diagonals were folded into m
        base = l_masked
        if pos_count > 1:
            # The other positives' diagonals are masked to 0 by the reference, so
            # each contributes exp(0 - m).
            base = base + (pos_count - 1) * jnp.exp(-m)
        total = jnp.float32(0.0)
        for i in range(pos_count):
            lse_i = m + jnp.log(base + e_d[:, i:i + 1])                     # (B, 1)
            total = total + jnp.mean(lse_i - d[:, i:i + 1])  # CE, labels = arange(B)
        out_ref[...] = jnp.reshape(total / pos_count, (1, 1))


def _divisors(n):
    return [d for d in range(1, n + 1) if n % d == 0]


def _vmem_budget_bytes():
    """75% of this chip's per-core VMEM (~48 MiB v7x, ~96 MiB v5e/v6e)."""
    cap = 64 * 1024 * 1024
    try:
        info = pltpu.get_tpu_info()
        cap = int(getattr(info, "vmem_capacity_bytes", cap) or cap)
    except Exception:
        pass
    budget = (cap * 3) // 4
    return max(32 * 1024 * 1024, min(budget, 100 * 1024 * 1024))


def _choose_tiling(K, B, D, in_bytes, mm_bytes, budget, max_tile_cols, max_chunk_cols):
    """Pick (tile_cols, chunk_cols): both multiples of B, tile divides N=B*(K-1)."""
    divs = _divisors(K - 1)
    # Reserve room for per-chunk f32 / MXU-dtype temporaries + misc headroom.
    chunk_reserve = min(max_chunk_cols, max(B, 2048)) * D * (8 + mm_bytes) + (4 << 20)
    cap_cols = max(B, (budget - chunk_reserve) // max(1, 2 * D * in_bytes))
    if max_tile_cols is not None:
        cap_cols = min(cap_cols, max_tile_cols)
    g = max([d for d in divs if B * d <= cap_cols] or [1])
    h_cands = [d for d in divs if g % d == 0 and B * d <= max_chunk_cols] or [1]
    h = max(h_cands)
    dense = [d for d in h_cands if (B * d) % 128 == 0]   # prefer lane-dense chunks
    if dense and 2 * max(dense) >= h:
        h = max(dense)
    if B % 8 != 0:
        # Keep the (8,128) tiling constraint trivially satisfied for odd batch sizes.
        g, h = K - 1, K - 1
    return B * g, B * h


def supervised_mpn_ranking_loss(reps, scale=20.0, pos_count=1, *,
                                mxu_bf16=None, max_tile_cols=None,
                                max_chunk_cols=2048):
    """reps: (K, B, D); reps[0]=anchors, reps[1..pos_count]=positives, rest negatives.

    Embeddings are consumed in their own dtype (f32 or bf16); normalization and the
    logsumexp run in f32 inside the kernel.  `mxu_bf16=None` -> bf16 MXU operands iff
    the embeddings are bf16 (pass True explicitly on v6e/v7x for f32 embeddings).
    """
    reps = jnp.asarray(reps)
    if reps.dtype not in (jnp.float32, jnp.bfloat16):
        reps = reps.astype(jnp.float32)
    if mxu_bf16 is None:
        mxu_bf16 = reps.dtype == jnp.bfloat16
    K, B, D = reps.shape
    assert 1 <= pos_count <= K - 1
    N = B * (K - 1)

    anchors = reps[0]                      # (B, D)
    cand = reps[1:].reshape(N, D)          # contiguous collapse: no copy, no transpose

    in_bytes = reps.dtype.itemsize
    mm_bytes = 2 if mxu_bf16 else 4
    budget = _vmem_budget_bytes()
    tn, cn = _choose_tiling(K, B, D, in_bytes, mm_bytes, budget,
                            max_tile_cols, max_chunk_cols)
    num_tiles = N // tn

    kernel = functools.partial(
        _mpn_loss_kernel, scale=float(scale), pos_count=int(pos_count),
        batch_size=B, tile_cols=tn, chunk_cols=cn, mxu_bf16=bool(mxu_bf16))

    out = pl.pallas_call(
        kernel,
        out_shape=jax.ShapeDtypeStruct((1, 1), jnp.float32),
        grid_spec=pltpu.PrefetchScalarGridSpec(
            num_scalar_prefetch=0,
            grid=(num_tiles,),
            in_specs=[
                pl.BlockSpec((B, D), lambda t: (0, 0)),    # anchors (resident)
                pl.BlockSpec((tn, D), lambda t: (t, 0)),   # candidate DMA tile
            ],
            out_specs=pl.BlockSpec((1, 1), lambda t: (0, 0)),
            scratch_shapes=[
                pltpu.VMEM((B, D), jnp.float32),                                # a_n (f32, scaled)
                pltpu.VMEM((B, D), jnp.bfloat16 if mxu_bf16 else jnp.float32),  # a_n (MXU dtype)
                pltpu.VMEM((B, 1), jnp.float32),                                # running max
                pltpu.VMEM((B, 1), jnp.float32),                                # running masked sum
                pltpu.VMEM((B, pos_count), jnp.float32),                        # positive diagonals
            ],
        ),
        compiler_params=pltpu.CompilerParams(
            dimension_semantics=("arbitrary",),            # sequential reduction over N tiles
            vmem_limit_bytes=int(budget),
        ),
    )(anchors, cand)
    return out[0, 0]


def _reference_loss(reps_f32, scale, pos_count):
    """Pure-JAX mirror of the PyTorch compute_loss for verification."""
    K, B, D = reps_f32.shape
    N = B * (K - 1)
    eps = 1e-12
    a = reps_f32[0]
    a_n = a / jnp.maximum(jnp.linalg.norm(a, axis=-1, keepdims=True), eps)
    total = 0.0
    for i in range(1, pos_count + 1):
        order = [i] + [j for j in range(1, K) if j != i]
        b = jnp.concatenate([reps_f32[j] for j in order], axis=0)
        b_n = b / jnp.maximum(jnp.linalg.norm(b, axis=-1, keepdims=True), eps)
        scores = jnp.dot(a_n, b_n.T, precision=lax.Precision.HIGHEST) * scale
        row = jnp.arange(B)[:, None]
        col = jnp.arange(N)[None, :]
        masked = (col % B == row) & (col >= B) & (col < B * pos_count)
        scores = jnp.where(masked, 0.0, scores)
        lse = jax.scipy.special.logsumexp(scores, axis=-1)
        diag = scores[jnp.arange(B), jnp.arange(B)]
        total = total + jnp.mean(lse - diag)
    return total / pos_count


if __name__ == "__main__":
    # TODO(synk): the SentenceTransformer encoder (self.model) has no Pallas
    # equivalent here; the kernel consumes precomputed sentence embeddings.
    def run_case(B, D, pos_count, neg_count, scale, *, dtype=jnp.float32,
                 mxu_bf16=None, max_tile_cols=None, max_chunk_cols=2048,
                 rtol=1e-4, atol=1e-4, seed=0):
        K = 1 + pos_count + neg_count
        key = jax.random.PRNGKey(seed)
        reps = jax.random.normal(key, (K, B, D), dtype=jnp.float32).astype(dtype)
        loss = supervised_mpn_ranking_loss(
            reps, scale=scale, pos_count=pos_count, mxu_bf16=mxu_bf16,
            max_tile_cols=max_tile_cols, max_chunk_cols=max_chunk_cols)
        loss = jax.block_until_ready(loss)
        ref = jax.block_until_ready(
            _reference_loss(reps.astype(jnp.float32), scale, pos_count))
        assert jnp.allclose(loss, ref, rtol=rtol, atol=atol), (loss, ref)

    # 1) f32, 2 positives + 2 negatives, single tile / single chunk.
    run_case(B=8, D=128, pos_count=2, neg_count=2, scale=20.0)
    # 2) f32, multi-tile + multi-chunk along N (online LSE across tiles, chunked
    #    compute, positive blocks landing in different tiles/chunks).
    run_case(B=8, D=128, pos_count=5, neg_count=3, scale=20.0,
             max_tile_cols=32, max_chunk_cols=16)
    # 3) f32, pos_count == 1 path (no masked columns at all).
    run_case(B=8, D=128, pos_count=1, neg_count=3, scale=20.0)
    # 4) bf16 embeddings end-to-end: bf16 HBM stream + bf16 MXU, f32 diagonals.
    run_case(B=8, D=128, pos_count=2, neg_count=2, scale=20.0,
             dtype=jnp.bfloat16, rtol=5e-2, atol=1e-1)

    print("KERNEL_OK")
</pallas_src>

<mosaic_0001>
module attributes {stable_mosaic.version = 11 : i64} {
  func.func @_mpn_loss_kernel(%arg0: i32, %arg1: memref<8x128xf32, #tpu.memory_space<vmem>>, %arg2: memref<32x128xf32, #tpu.memory_space<vmem>>, %arg3: memref<1x1xf32, #tpu.memory_space<vmem>>, %arg4: memref<8x128xf32, #tpu.memory_space<vmem>>, %arg5: memref<8x128xf32, #tpu.memory_space<vmem>>, %arg6: memref<8x1xf32, #tpu.memory_space<vmem>>, %arg7: memref<8x1xf32, #tpu.memory_space<vmem>>, %arg8: memref<8x2xf32, #tpu.memory_space<vmem>>) attributes {dimension_semantics = [#tpu.dimension_semantics<arbitrary>], iteration_bounds = array<i64: 1>, scalar_prefetch = 0 : i64, scratch_operands = 5 : i64, tpu.core_type = #tpu.core_type<tc>, window_params = [{pipeline_mode = #tpu.pipeline_mode<synchronous>, transform_indices = @transform_0, window_bounds = array<i64: 8, 128>}, {transform_indices = @transform_1, window_bounds = array<i64: 32, 128>}, {pipeline_mode = #tpu.pipeline_mode<synchronous>, transform_indices = @transform_2, window_bounds = array<i64: 1, 1>}]} {
    %c0_i32 = arith.constant 0 : i32
    %0 = arith.cmpi eq, %arg0, %c0_i32 : i32
    %1 = arith.extui %0 : i1 to i32
    %c0_i32_0 = arith.constant 0 : i32
    %2 = arith.cmpi ne, %1, %c0_i32_0 : i32
    scf.if %2 {
      %c0_31 = arith.constant 0 : index
      %c0_32 = arith.constant 0 : index
      %70 = vector.load %arg1[%c0_31, %c0_32] : memref<8x128xf32, #tpu.memory_space<vmem>>, vector<8x128xf32>
      %71 = arith.mulf %70, %70 : vector<8x128xf32>
      %cst_33 = arith.constant dense<0.000000e+00> : vector<8xf32>
      %72 = vector.multi_reduction <add>, %71, %cst_33 [1] : vector<8x128xf32> to vector<8xf32>
      %73 = vector.shape_cast %72 : vector<8xf32> to vector<8x1xf32>
      %cst_34 = arith.constant 1.000000e-24 : f32
      %74 = vector.broadcast %cst_34 : f32 to vector<8x1xf32>
      %75 = arith.maximumf %73, %74 : vector<8x1xf32>
      %76 = math.rsqrt %75 : vector<8x1xf32>
      %cst_35 = arith.constant 2.000000e+01 : f32
      %77 = vector.broadcast %cst_35 : f32 to vector<8x1xf32>
      %78 = arith.mulf %76, %77 : vector<8x1xf32>
      %79 = vector.broadcast %78 : vector<8x1xf32> to vector<8x128xf32>
      %80 = arith.mulf %70, %79 : vector<8x128xf32>
      %c0_36 = arith.constant 0 : index
      %c0_37 = arith.constant 0 : index
      %81 = vector.load %arg4[%c0_36, %c0_37] : memref<8x128xf32, #tpu.memory_space<vmem>>, vector<8x128xf32>
      tpu.vector_store %arg4[%c0_36, %c0_37], %80 {strides = array<i32>} : memref<8x128xf32, #tpu.memory_space<vmem>>, vector<8x128xf32>,
      %c0_38 = arith.constant 0 : index
      %c0_39 = arith.constant 0 : index
      %82 = vector.load %arg5[%c0_38, %c0_39] : memref<8x128xf32, #tpu.memory_space<vmem>>, vector<8x128xf32>
      tpu.vector_store %arg5[%c0_38, %c0_39], %80 {strides = array<i32>} : memref<8x128xf32, #tpu.memory_space<vmem>>, vector<8x128xf32>,
      %cst_40 = arith.constant 0.000000e+00 : f32
      %83 = vector.broadcast %cst_40 : f32 to vector<8x1xf32>
      %c0_41 = arith.constant 0 : index
      %c0_42 = arith.constant 0 : index
      %84 = vector.load %arg6[%c0_41, %c0_42] : memref<8x1xf32, #tpu.memory_space<vmem>>, vector<8x1xf32>
      tpu.vector_store %arg6[%c0_41, %c0_42], %83 {strides = array<i32>} : memref<8x1xf32, #tpu.memory_space<vmem>>, vector<8x1xf32>,
      %cst_43 = arith.constant 0.000000e+00 : f32
      %85 = vector.broadcast %cst_43 : f32 to vector<8x1xf32>
      %c0_44 = arith.constant 0 : index
      %c0_45 = arith.constant 0 : index
      %86 = vector.load %arg7[%c0_44, %c0_45] : memref<8x1xf32, #tpu.memory_space<vmem>>, vector<8x1xf32>
      tpu.vector_store %arg7[%c0_44, %c0_45], %85 {strides = array<i32>} : memref<8x1xf32, #tpu.memory_space<vmem>>, vector<8x1xf32>,
      %cst_46 = arith.constant 0.000000e+00 : f32
      %87 = vector.broadcast %cst_46 : f32 to vector<8x2xf32>
      %c0_47 = arith.constant 0 : index
      %c0_48 = arith.constant 0 : index
      %88 = vector.load %arg8[%c0_47, %c0_48] : memref<8x2xf32, #tpu.memory_space<vmem>>, vector<8x2xf32>
      tpu.vector_store %arg8[%c0_47, %c0_48], %87 {strides = array<i32>} : memref<8x2xf32, #tpu.memory_space<vmem>>, vector<8x2xf32>,
    } else {
    }
    %c0 = arith.constant 0 : index
    %c0_1 = arith.constant 0 : index
    %3 = vector.load %arg4[%c0, %c0_1] : memref<8x128xf32, #tpu.memory_space<vmem>>, vector<8x128xf32>
    %c0_2 = arith.constant 0 : index
    %c0_3 = arith.constant 0 : index
    %4 = vector.load %arg5[%c0_2, %c0_3] : memref<8x128xf32, #tpu.memory_space<vmem>>, vector<8x128xf32>
    %c0_4 = arith.constant 0 : index
    %c0_5 = arith.constant 0 : index
    %5 = vector.load %arg2[%c0_4, %c0_5] : memref<32x128xf32, #tpu.memory_space<vmem>>, vector<32x128xf32>
    %6 = arith.mulf %5, %5 : vector<32x128xf32>
    %cst = arith.constant dense<0.000000e+00> : vector<32xf32>
    %7 = vector.multi_reduction <add>, %6, %cst [1] : vector<32x128xf32> to vector<32xf32>
    %8 = vector.shape_cast %7 : vector<32xf32> to vector<32x1xf32>
    %cst_6 = arith.constant 1.000000e-24 : f32
    %9 = vector.broadcast %cst_6 : f32 to vector<32x1xf32>
    %10 = arith.maximumf %8, %9 : vector<32x1xf32>
    %11 = math.rsqrt %10 : vector<32x1xf32>
    %12 = vector.broadcast %11 : vector<32x1xf32> to vector<32x128xf32>
    %13 = arith.mulf %5, %12 : vector<32x128xf32>
    %cst_7 = arith.constant dense<0.000000e+00> : vector<8x32xf32>
    %14 = tpu.matmul %4, %13, %cst_7 {dimension_numbers = #tpu.dot_dimension_numbers<[1], [1], [0], [0], [0, 0, 1, 0], [], []>} : vector<8x128xf32>, vector<32x128xf32>, vector<8x32xf32> -> vector<8x32xf32>
    %15 = tpu.iota {dimensions = array<i32: 1>} : vector<8x32xi32>
    %16 = tpu.iota {dimensions = array<i32: 0>} : vector<8x32xi32>
    %c0_i32_8 = arith.constant 0 : i32
    %17 = arith.cmpi eq, %arg0, %c0_i32_8 : i32
    %18 = vector.extract_strided_slice %13 {offsets = [0, 0], sizes = [8, 128], strides = [1, 1]} : vector<32x128xf32> to vector<8x128xf32>
    %19 = arith.mulf %3, %18 : vector<8x128xf32>
    %cst_9 = arith.constant dense<0.000000e+00> : vector<8xf32>
    %20 = vector.multi_reduction <add>, %19, %cst_9 [1] : vector<8x128xf32> to vector<8xf32>
    %21 = vector.shape_cast %20 : vector<8xf32> to vector<8x1xf32>
    %22 = arith.extui %17 : i1 to i32
    %c0_i32_10 = arith.constant 0 : i32
    %23 = arith.cmpi ne, %22, %c0_i32_10 : i32
    scf.if %23 {
      %c0_31 = arith.constant 0 : index
      %c0_32 = arith.constant 0 : index
      %70 = vector.load %arg8[%c0_31, %c0_32] : memref<8x2xf32, #tpu.memory_space<vmem>>, vector<8x1xf32>
      tpu.vector_store %arg8[%c0_31, %c0_32], %21 {strides = array<i32>} : memref<8x2xf32, #tpu.memory_space<vmem>>, vector<8x1xf32>,
    } else {
    }
    %c0_i32_11 = arith.constant 0 : i32
    %24 = vector.broadcast %c0_i32_11 : i32 to vector<8x32xi32>
    %25 = arith.addi %16, %24 : vector<8x32xi32>
    %26 = arith.cmpi eq, %15, %25 : vector<8x32xi32>
    %27 = vector.broadcast %17 : i1 to vector<8x32xi1>
    %28 = arith.andi %26, %27 : vector<8x32xi1>
    %cst_12 = arith.constant -1.000000e+30 : f32
    %29 = vector.broadcast %cst_12 : f32 to vector<8x32xf32>
    %30 = arith.select %28, %29, %14 : vector<8x32xi1>, vector<8x32xf32>
    %cst_13 = arith.constant 0xFF800000 : f32
    %31 = vector.broadcast %cst_13 : f32 to vector<8x1xf32>
    %32 = arith.select %17, %21, %31 : vector<8x1xf32>
    %c0_i32_14 = arith.constant 0 : i32
    %33 = arith.cmpi eq, %arg0, %c0_i32_14 : i32
    %34 = vector.extract_strided_slice %13 {offsets = [8, 0], sizes = [8, 128], strides = [1, 1]} : vector<32x128xf32> to vector<8x128xf32>
    %35 = arith.mulf %3, %34 : vector<8x128xf32>
    %cst_15 = arith.constant dense<0.000000e+00> : vector<8xf32>
    %36 = vector.multi_reduction <add>, %35, %cst_15 [1] : vector<8x128xf32> to vector<8xf32>
    %37 = vector.shape_cast %36 : vector<8xf32> to vector<8x1xf32>
    %38 = arith.extui %33 : i1 to i32
    %c0_i32_16 = arith.constant 0 : i32
    %39 = arith.cmpi ne, %38, %c0_i32_16 : i32
    scf.if %39 {
      %c0_31 = arith.constant 0 : index
      %c1 = arith.constant 1 : index
      %70 = vector.load %arg8[%c0_31, %c1] : memref<8x2xf32, #tpu.memory_space<vmem>>, vector<8x1xf32>
      tpu.vector_store %arg8[%c0_31, %c1], %37 {strides = array<i32>} : memref<8x2xf32, #tpu.memory_space<vmem>>, vector<8x1xf32>,
    } else {
    }
    %c8_i32 = arith.constant 8 : i32
    %40 = vector.broadcast %c8_i32 : i32 to vector<8x32xi32>
    %41 = arith.addi %16, %40 : vector<8x32xi32>
    %42 = arith.cmpi eq, %15, %41 : vector<8x32xi32>
    %43 = vector.broadcast %33 : i1 to vector<8x32xi1>
    %44 = arith.andi %42, %43 : vector<8x32xi1>
    %cst_17 = arith.constant -1.000000e+30 : f32
    %45 = vector.broadcast %cst_17 : f32 to vector<8x32xf32>
    %46 = arith.select %44, %45, %30 : vector<8x32xi1>, vector<8x32xf32>
    %cst_18 = arith.constant 0xFF800000 : f32
    %47 = vector.broadcast %cst_18 : f32 to vector<8x1xf32>
    %48 = arith.select %33, %37, %47 : vector<8x1xf32>
    %49 = arith.maximumf %32, %48 : vector<8x1xf32>
    %cst_19 = arith.constant dense<0xFF800000> : vector<8xf32>
    %50 = vector.multi_reduction <maximumf>, %46, %cst_19 [1] : vector<8x32xf32> to vector<8xf32>
    %51 = vector.shape_cast %50 : vector<8xf32> to vector<8x1xf32>
    %52 = arith.maximumf %51, %49 : vector<8x1xf32>
    %c0_20 = arith.constant 0 : index
    %c0_21 = arith.constant 0 : index
    %53 = vector.load %arg6[%c0_20, %c0_21] : memref<8x1xf32, #tpu.memory_space<vmem>>, vector<8x1xf32>
    %54 = arith.maximumf %53, %52 : vector<8x1xf32>
    %55 = arith.subf %53, %54 : vector<8x1xf32>
    %56 = math.exp %55 : vector<8x1xf32>
    %c0_22 = arith.constant 0 : index
    %c0_23 = arith.constant 0 : index
    %57 = vector.load %arg7[%c0_22, %c0_23] : memref<8x1xf32, #tpu.memory_space<vmem>>, vector<8x1xf32>
    %58 = arith.mulf %56, %57 : vector<8x1xf32>
    %59 = vector.broadcast %54 : vector<8x1xf32> to vector<8x32xf32>
    %60 = arith.subf %46, %59 : vector<8x32xf32>
    %61 = math.exp %60 : vector<8x32xf32>
    %cst_24 = arith.constant dense<0.000000e+00> : vector<8xf32>
    %62 = vector.multi_reduction <add>, %61, %cst_24 [1] : vector<8x32xf32> to vector<8xf32>
    %63 = vector.shape_cast %62 : vector<8xf32> to vector<8x1xf32>
    %64 = arith.addf %58, %63 : vector<8x1xf32>
    %c0_25 = arith.constant 0 : index
    %c0_26 = arith.constant 0 : index
    %65 = vector.load %arg7[%c0_25, %c0_26] : memref<8x1xf32, #tpu.memory_space<vmem>>, vector<8x1xf32>
    tpu.vector_store %arg7[%c0_25, %c0_26], %64 {strides = array<i32>} : memref<8x1xf32, #tpu.memory_space<vmem>>, vector<8x1xf32>,
    %c0_27 = arith.constant 0 : index
    %c0_28 = arith.constant 0 : index
    %66 = vector.load %arg6[%c0_27, %c0_28] : memref<8x1xf32, #tpu.memory_space<vmem>>, vector<8x1xf32>
    tpu.vector_store %arg6[%c0_27, %c0_28], %54 {strides = array<i32>} : memref<8x1xf32, #tpu.memory_space<vmem>>, vector<8x1xf32>,
    %c0_i32_29 = arith.constant 0 : i32
    %67 = arith.cmpi eq, %arg0, %c0_i32_29 : i32
    %68 = arith.extui %67 : i1 to i32
    %c0_i32_30 = arith.constant 0 : i32
    %69 = arith.cmpi ne, %68, %c0_i32_30 : i32
    scf.if %69 {
      %c0_31 = arith.constant 0 : index
      %c0_32 = arith.constant 0 : index
      %70 = vector.load %arg6[%c0_31, %c0_32] : memref<8x1xf32, #tpu.memory_space<vmem>>, vector<8x1xf32>
      %c0_33 = arith.constant 0 : index
      %c0_34 = arith.constant 0 : index
      %71 = vector.load %arg7[%c0_33, %c0_34] : memref<8x1xf32, #tpu.memory_space<vmem>>, vector<8x1xf32>
      %c0_35 = arith.constant 0 : index
      %c0_36 = arith.constant 0 : index
      %72 = vector.load %arg8[%c0_35, %c0_36] : memref<8x2xf32, #tpu.memory_space<vmem>>, vector<8x2xf32>
      %73 = vector.broadcast %70 : vector<8x1xf32> to vector<8x2xf32>
      %74 = arith.subf %72, %73 : vector<8x2xf32>
      %75 = math.exp %74 : vector<8x2xf32>
      %cst_37 = arith.constant 0.000000e+00 : f32
      %76 = vector.broadcast %cst_37 : f32 to vector<8x1xf32>
      %77 = arith.subf %76, %70 : vector<8x1xf32>
      %78 = math.exp %77 : vector<8x1xf32>
      %cst_38 = arith.constant 1.000000e+00 : f32
      %79 = vector.broadcast %cst_38 : f32 to vector<8x1xf32>
      %80 = arith.mulf %79, %78 : vector<8x1xf32>
      %81 = arith.addf %71, %80 : vector<8x1xf32>
      %82 = vector.extract_strided_slice %75 {offsets = [0, 0], sizes = [8, 1], strides = [1, 1]} : vector<8x2xf32> to vector<8x1xf32>
      %83 = arith.addf %81, %82 : vector<8x1xf32>
      %84 = math.log %83 : vector<8x1xf32>
      %85 = arith.addf %70, %84 : vector<8x1xf32>
      %86 = vector.extract_strided_slice %72 {offsets = [0, 0], sizes = [8, 1], strides = [1, 1]} : vector<8x2xf32> to vector<8x1xf32>
      %87 = arith.subf %85, %86 : vector<8x1xf32>
      %88 = vector.shape_cast %87 : vector<8x1xf32> to vector<1x8x1xf32>
      %cst_39 = arith.constant dense<0.000000e+00> : vector<1xf32>
      %89 = vector.multi_reduction <add>, %88, %cst_39 [1, 2] : vector<1x8x1xf32> to vector<1xf32>
      %90 = vector.shape_cast %89 : vector<1xf32> to vector<1x1x1xf32>
      %91 = vector.extract %90[0, 0, 0] : f32 from vector<1x1x1xf32>
      %cst_40 = arith.constant 8.000000e+00 : f32
      %92 = arith.divf %91, %cst_40 : f32
      %cst_41 = arith.constant 0.000000e+00 : f32
      %93 = arith.addf %cst_41, %92 : f32
      %94 = vector.extract_strided_slice %75 {offsets = [0, 1], sizes = [8, 1], strides = [1, 1]} : vector<8x2xf32> to vector<8x1xf32>
      %95 = arith.addf %81, %94 : vector<8x1xf32>
      %96 = math.log %95 : vector<8x1xf32>
      %97 = arith.addf %70, %96 : vector<8x1xf32>
      %98 = vector.extract_strided_slice %72 {offsets = [0, 1], sizes = [8, 1], strides = [1, 1]} : vector<8x2xf32> to vector<8x1xf32>
      %99 = arith.subf %97, %98 : vector<8x1xf32>
      %100 = vector.shape_cast %99 : vector<8x1xf32> to vector<1x8x1xf32>
      %cst_42 = arith.constant dense<0.000000e+00> : vector<1xf32>
      %101 = vector.multi_reduction <add>, %100, %cst_42 [1, 2] : vector<1x8x1xf32> to vector<1xf32>
      %102 = vector.shape_cast %101 : vector<1xf32> to vector<1x1x1xf32>
      %103 = vector.extract %102[0, 0, 0] : f32 from vector<1x1x1xf32>
      %cst_43 = arith.constant 8.000000e+00 : f32
      %104 = arith.divf %103, %cst_43 : f32
      %105 = arith.addf %93, %104 : f32
      %cst_44 = arith.constant 2.000000e+00 : f32
      %106 = arith.divf %105, %cst_44 : f32
      %107 = vector.broadcast %106 : f32 to vector<1x1xf32>
      %c0_45 = arith.constant 0 : index
      %c0_46 = arith.constant 0 : index
      %108 = vector.load %arg3[%c0_45, %c0_46] : memref<1x1xf32, #tpu.memory_space<vmem>>, vector<1x1xf32>
      tpu.vector_store %arg3[%c0_45, %c0_46], %107 {strides = array<i32>} : memref<1x1xf32, #tpu.memory_space<vmem>>, vector<1x1xf32>,
    } else {
    }
    return
  }
  func.func @transform_0(%arg0: i32) -> (i32, i32) {
    %c0_i32 = arith.constant 0 : i32
    %c0_i32_0 = arith.constant 0 : i32
    %c0_i32_1 = arith.constant 0 : i32
    return %c0_i32, %c0_i32_0 : i32, i32
  }
  func.func @transform_1(%arg0: i32) -> (i32, i32) {
    %c0_i32 = arith.constant 0 : i32
    %c0_i32_0 = arith.constant 0 : i32
    return %arg0, %c0_i32 : i32, i32
  }
  func.func @transform_2(%arg0: i32) -> (i32, i32) {
    %c0_i32 = arith.constant 0 : i32
    %c0_i32_0 = arith.constant 0 : i32
    %c0_i32_1 = arith.constant 0 : i32
    return %c0_i32, %c0_i32_0 : i32, i32
  }
}

</mosaic_0001>

<bundles_post_ra>
// kernel: tpu_custom_call.1
= control target key start
LH: loop header
LB: loop body
LE: loop exit
PB: predicated region body
PF: predicated region fallthrough
CT: control target
= control target key end

     0   :  { %7 = vsyncpa [#allocation8], 0  ;;  %s512_s0 = inlined_call_operand.hbm [shape: f32[8,128], index: 0, kind: input, shape index: {}]   ;;  %s513_s1 = inlined_call_operand.hbm [shape: f32[32,128], index: 1, kind: input, shape index: {}]   ;;  %s514_s2 = inlined_call_operand.hbm [shape: f32[1,1], index: 2, kind: output, shape index: {}]  }
   0x1   :  { %8 = vsyncpa [#allocation11], 0 }
   0x2   :  { %9 = vsyncpa [#allocation9], 0  ;;  %s435_s9 = smov [#allocation7]   ;;  %s436_s11 = smov [#allocation10]  }
   0x3   :  { %s16_s10 = sshll.u32 %s435_s9, 4  ;;  %s25_s12 = sshll.u32 %s436_s11, 4  ;;  %s17_s10 = int_to_ptr.vmem [resolvable:$true] %s16_s10  ;;  %s460_s12 = int_to_ptr.vmem [resolvable:$true] %s25_s12 }
   0x4   :  { %s363_s15 = scalar_lea.hbm %s512_s0, 128 }
   0x5   :  { %p364_p0 = scmp.ne.s32.totalorder %s512_s0, %s363_s15  ;;  %p367_p1 = scmp.lt.u32.totalorder %s363_s15, %s512_s0 }
   0x7   :  { %p369_p2 = pnand %p367_p1, %p364_p0 }
   0x9   :  { %372 = shalt.err (!%p369_p2)
}
   0xa   :  { %s373_s20 = scalar_lea.vmem %s17_s10, 128  ;;  %p378_p4 = scmp.lt.s32.totalorder %s17_s10, %s17_s10 }
   0xb   :  { %p374_p3 = scmp.ne.s32.totalorder %s17_s10, %s373_s20  ;;  %p379_p5 = scmp.lt.s32.totalorder %s373_s20, %s373_s20 }
   0xd   :  { %p380_p6 = por %p379_p5, %p378_p4 }
   0xf   :  { %p381_p7 = pnand %p380_p6, %p374_p3 }
  0x11   :  { %384 = shalt.err (!%p381_p7)
}
  0x12   :  { %19 = dma.hbm_to_vmem [thread:$0]  %s512_s0, 128, %s17_s10, [#allocation8]  }
  0x13   :  { %s385_s25 = scalar_lea.hbm %s513_s1, 512 }
  0x14   :  { %p386_p8 = scmp.ne.s32.totalorder %s513_s1, %s385_s25  ;;  %p389_p9 = scmp.lt.u32.totalorder %s385_s25, %s513_s1 }
  0x16   :  { %p391_p10 = pnand %p389_p9, %p386_p8 }
  0x18   :  { %394 = shalt.err (!%p391_p10)
}
  0x19   :  { %s395_s30 = scalar_lea.vmem %s460_s12, 512  ;;  %p400_p12 = scmp.lt.s32.totalorder %s460_s12, %s460_s12 }
  0x1a   :  { %p396_p11 = scmp.ne.s32.totalorder %s460_s12, %s395_s30  ;;  %p401_p13 = scmp.lt.s32.totalorder %s395_s30, %s395_s30 }
  0x1c   :  { %p402_p0 = por %p401_p13, %p400_p12 }
  0x1e   :  { %p403_p1 = pnand %p402_p0, %p396_p11 }
  0x20   :  { %406 = shalt.err (!%p403_p1)
}
  0x21   :  { %s437_s0 = smov 128   ;;  %s438_s3 = smov 8  }
  0x22   :  { %31 = dma.hbm_to_vmem [thread:$0]  %s513_s1, 512, %s460_s12, [#allocation11], %s437_s0, %s437_s0, %s438_s3  }
  0x23   :  { %429 = dma.done.wait [#allocation8], 128  }
  0x24   :  { %430 = vsyncadd [#allocation8], 4294967168 }
  0x25   :  { %431 = dma.done.wait [#allocation11], 512  }
  0x26   :  { %432 = vsyncadd [#allocation11], 4294966784  ;;  %v59_v0 = vld [vmem:[#allocation10] sm:$0xff]  ;;  %v61_v1 = vld [vmem:[#allocation10 + $0x10] sm:$0xff]  ;;  %v439_v10 = vmov 0.0|0.0   ;;  %vm52_vm0 = vcmask 7168   ;;  %v157_v39 = vlaneseq }
  0x27   :  { %v60_v2 = vld [vmem:[#allocation10 + $0x8] sm:$0xff]  ;;  %v63_v3 = vmul.f32 %v59_v0, %v59_v0  ;;  %v65_v4 = vmul.f32 %v61_v1, %v61_v1  ;;  %v62_v5 = vld [vmem:[#allocation10 + $0x18] sm:$0xff]  ;;  %319 = vmatprep.subr.bf16.mxu0 %v439_v10  ;;  %v440_v11 = vmov 0.0   ;;  %vm441_vm1 = vmmov 0   ;;  %s443_s1 = smov 127   ;;  %s444_s11 = smov [#allocation12]  }
  0x28   :  { %v64_v6 = vmul.f32 %v60_v2, %v60_v2  ;;  %v66_v7 = vmul.f32 %v62_v5, %v62_v5  ;;  %v42_v8 = vld [vmem:[#allocation7] sm:$0xff]  ;;  %53 = vst.msk [vmem:[#allocation4] sm:$0xff] %vm52_vm0, %v440_v11  ;;  %54 = vst.msk [vmem:[#allocation5] sm:$0xff] %vm52_vm0, %v440_v11  ;;  %316 = vmatprep.mubr.msk.f32.mxu0 %vm441_vm1, %v440_v11  ;;  %vm55_vm2 = vcmask 15360   ;;  %vm182_vm3 = vcmask 15368   ;;  %s293_s12 = sshll.u32 %s444_s11, 4  ;;  %s294_s12 = int_to_ptr.vmem [resolvable:$true] %s293_s12 }
  0x29   :  { %67 = vadd.xlane.f32.xlu0 %v63_v3  ;;  %71 = vadd.xlane.f32.xlu1 %v65_v4  ;;  %v43_v9 = vmul.f32 %v42_v8, %v42_v8  ;;  %56 = vst.msk [vmem:[#allocation6] sm:$0xff] %vm55_vm2, %v440_v11  ;;  %v160_v40 = vshrl.u32 %v157_v39, 7  ;;  %v158_v41 = vand.u32 127, %v157_v39  ;;  %vm190_vm6 = vcmask 261120   ;;  %s407_s14 = scalar_lea.vmem %s294_s12, 16  ;;  %s411_s15 = scalar_lea.vmem %s294_s12, 32 }
  0x2a   :  { %v442_v48 = vmov 0   ;;  %vm285_vm7 = vcmask 0   ;;  %p408_p2 = scmp.ne.s32.totalorder %s294_s12, %s407_s14  ;;  %p412_p3 = scmp.lt.s32.totalorder %s294_s12, %s294_s12 }
  0x2b   :  { %v184_v42 = vadd.s32 8, %v160_v40  ;;  %vm169_vm4 = vcmp.eq.s32.totalorder %v158_v41, %v160_v40  ;;  %339 = vset.pattern.permute.xlu0 %v442_v48  ;;  %340 = vset.pattern.permute.xlu1 %v442_v48  ;;  %p413_p4 = scmp.lt.s32.totalorder %s411_s15, %s407_s14 }
  0x2d   :  { %69 = vadd.xlane.f32.xlu0 %v64_v6  ;;  %73 = vadd.xlane.f32.xlu1 %v66_v7  ;;  %vm185_vm5 = vcmp.eq.s32.totalorder %v158_v41, %v184_v42  ;;  %p414_p5 = por %p413_p4, %p412_p3 }
  0x2f   :  { %v195_v50 = vld [vmem:[#allocation4] sm:$0xff]  ;;  %v200_v6 = vld [vmem:[#allocation5] sm:$0xff]  ;;  %p415_p6 = pnand %p414_p5, %p408_p2 }
  0x31   :  { %44 = vadd.xlane.f32.xlu0 %v43_v9 }
  0xb6   :  { %v68_v12 = vpop.xlane.xlu0 %67  ;;  %v72_v13 = vpop.xlane.xlu1 %71 }
  0xb7   :  { %v75_v14 = vmax.f32 %v68_v12, 1e-24  ;;  %v77_v17 = vmax.f32 %v72_v13, 1e-24 }
  0xb9   :  { %341 = vrsqrt.f32 %v75_v14 }
  0xba   :  { %v70_v15 = vpop.xlane.xlu0 %69  ;;  %v74_v16 = vpop.xlane.xlu1 %73 }
  0xbb   :  { %v76_v18 = vmax.f32 %v70_v15, 1e-24  ;;  %v78_v19 = vmax.f32 %v74_v16, 1e-24 }
  0xbd   :  { %343 = vrsqrt.f32 %v76_v18 }
  0xbe   :  { %v45_v20 = vpop.xlane.xlu0 %44  ;;  %345 = vrsqrt.f32 %v77_v17 }
  0xbf   :  { %v46_v21 = vmax.f32 %v45_v20, 1e-24  ;;  %347 = vrsqrt.f32 %v78_v19 }
  0xc1   :  { %349 = vrsqrt.f32 %v46_v21 }
  0xc3   :  { %v342_v22 = vpop.eup %341 }
  0xc4   :  { %v83_v24 = vmul.f32 %v342_v22, %v59_v0 }
  0xc7   :  { %v344_v23 = vpop.eup %343 }
  0xc8   :  { %v84_v25 = vmul.f32 %v344_v23, %v60_v2  ;;  %v346_v26 = vpop.eup %345 }
  0xc9   :  { %v348_v27 = vpop.eup %347  ;;  %v85_v32 = vmul.f32 %v346_v26, %v61_v1 }
  0xca   :  { %v320_v28 = vpack.c.bf16 %v84_v25, %v83_v24  ;;  %v86_v33 = vmul.f32 %v348_v27, %v62_v5 }
  0xcb   :  { %v350_v29 = vpop.eup %349 }
  0xcc   :  { %v48_v30 = vmul.f32 20.0, %v350_v29  ;;  %321 = vmatpush3.bf16.xpose.msra.mxu0 %v320_v28  ;;  %v323_v36 = vpack.c.bf16 %v86_v33, %v85_v32 }
  0xcd   :  { %322 = vmatprep.subr.bf16.mxu0 %v439_v10 }
  0xce   :  { %v49_v31 = vmul.f32 %v48_v30, %v42_v8 }
  0xd0   :  { %v176_v34 = vmul.f32 %v84_v25, %v49_v31  ;;  %v161_v35 = vmul.f32 %v83_v24, %v49_v31 }
  0xd2   :  { %177 = vadd.xlane.f32.xlu0 %v176_v34  ;;  %162 = vadd.xlane.f32.xlu1 %v161_v35 }
  0xd4   :  { %324 = vmatpush3.bf16.xpose.msra.mxu0 %v323_v36 }
  0xdb   :  { %317 = vmatmul.mubr.f32.vlgmr.msra.gmra.mrb[0].mxu0 %v49_v31 }
 0x15f   :  { %v178_v37 = vpop.xlane.xlu0 %177  ;;  %v163_v38 = vpop.xlane.xlu1 %162 }
 0x160   :  { %168 = vst.msk [vmem:[#allocation6] sm:$0xff] %vm52_vm0, %v163_v38  ;;  %v189_v49 = vmax.f32 %v163_v38, %v178_v37 }
 0x161   :  { %183 = vst.msk [vmem:[#allocation6] sm:$0xff] %vm182_vm3, %v178_v37 }
 0x168   :  { %v222_v59 = vld [vmem:[#allocation6] sm:$0xff] }
 0x1ae   :  { %v153_v43 = vpop.f32.mrb[0].mxu0 }
 0x1af   :  { %v174_v44 = vsel %vm169_vm4, -1e+30, %v153_v43  ;;  %v318_v45 = vpop.f32.mrb[1].mxu0 }
 0x1b0   :  { %v187_v46 = vsel %vm185_vm5, -1e+30, %v174_v44 }
 0x1b1   :  { %v191_v47 = vsel %vm190_vm6, %v187_v46, -inf }
 0x1b2   :  { %192 = vmax.xlane.f32.xlu1 %v191_v47 }
 0x23f   :  { %v193_v51 = vpop.xlane.xlu1 %192 }
 0x240   :  { %v194_v52 = vmax.f32 %v193_v51, %v189_v49 }
 0x242   :  { %v196_v53 = vmax.f32 %v195_v50, %v194_v52 }
 0x244   :  { %v197_v54 = vsub.f32 %v195_v50, %v196_v53  ;;  %216 = vst.msk [vmem:[#allocation4] sm:$0xff] %vm52_vm0, %v196_v53  ;;  %204 = vperm.xlu0 %339, %v196_v53  }
 0x246   :  { %v198_v2 = vmul.f32 1.442695, %v197_v54 }
 0x24b   :  { %v220_v55 = vld [vmem:[#allocation4] sm:$0xff] }
 0x24c   :  { %225 = vperm.xlu1 %340, %v220_v55   ;;  %v231_v3 = vsub.f32 0.0, %v220_v55 }
 0x24e   :  { %v232_v5 = vmul.f32 1.442695, %v231_v3 }
 0x2c3   :  { %v205_v56 = vpop.permute.xlu0 %204 }
 0x2c4   :  { %v207_v57 = vsub.f32 %v187_v46, %v205_v56 }
 0x2c6   :  { %v208_v58 = vmul.f32 1.442695, %v207_v57 }
 0x2c8   :  { %351 = vpow2.f32 %v208_v58 }
 0x2cb   :  { %v226_v60 = vpop.permute.xlu1 %225 }
 0x2cc   :  { %v228_v61 = vsub.f32 %v222_v59, %v226_v60 }
 0x2ce   :  { %v229_v62 = vmul.f32 1.442695, %v228_v61 }
 0x2d0   :  { %353 = vpow2.f32 %v229_v62 }
 0x2d1   :  { %355 = vpow2.f32 %v198_v2 }
 0x2d2   :  { %v352_v63 = vpop.eup %351  ;;  %357 = vpow2.f32 %v232_v5 }
 0x2d3   :  { %v210_v0 = vsel %vm190_vm6, %v352_v63, 0.0 }
 0x2d4   :  { %211 = vadd.xlane.f32.xlu1 %v210_v0 }
 0x2da   :  { %v354_v1 = vpop.eup %353 }
 0x2db   :  { %255 = vrot.lane.b32.xlu0 %v354_v1, %s443_s1  ;;  %v356_v4 = vpop.eup %355 }
 0x2dc   :  { %v201_v7 = vmul.f32 %v356_v4, %v200_v6  ;;  %v358_v10 = vpop.eup %357 }
 0x2df   :  { %263 = vrot.lane.b32.xlu0 %v222_v59, %s443_s1 }
 0x34d   :  { %v256_v13 = vpop.permute.xlu0 %255 }
 0x351   :  { %v264_v21 = vpop.permute.xlu0 %263 }
 0x361   :  { %v212_v8 = vpop.xlane.xlu1 %211 }
 0x362   :  { %v213_v9 = vadd.f32 %v212_v8, %v201_v7 }
 0x364   :  { %215 = vst.msk [vmem:[#allocation5] sm:$0xff] %vm52_vm0, %v213_v9 }
 0x36b   :  { %v221_v11 = vld [vmem:[#allocation5] sm:$0xff] }
 0x36c   :  { %v234_v12 = vadd.f32 %v358_v10, %v221_v11 }
 0x36e   :  { %v258_v14 = vadd.f32 %v256_v13, %v234_v12  ;;  %v235_v15 = vadd.f32 %v354_v1, %v234_v12 }
 0x370   :  { %359 = vlog2.f32 %v258_v14 }
 0x371   :  { %361 = vlog2.f32 %v235_v15 }
 0x37a   :  { %v360_v16 = vpop.eup %359 }
 0x37b   :  { %v362_v17 = vpop.eup %361  ;;  %v260_v18 = vmul.f32 0.6931472, %v360_v16 }
 0x37c   :  { %v237_v19 = vmul.f32 0.6931472, %v362_v17 }
 0x37d   :  { %v261_v20 = vadd.f32 %v260_v18, %v220_v55 }
 0x37e   :  { %v238_v22 = vadd.f32 %v237_v19, %v220_v55 }
 0x37f   :  { %v266_v23 = vsub.f32 %v261_v20, %v264_v21 }
 0x380   :  { %v239_v24 = vsub.f32 %v238_v22, %v222_v59 }
 0x381   :  { %v267_v25 = vsel %vm52_vm0, %v266_v23, 0.0 }
 0x382   :  { %268 = vadd.xlane.f32.xlu1 %v267_v25  ;;  %v240_v26 = vsel %vm52_vm0, %v239_v24, 0.0 }
 0x383   :  { %241 = vadd.xlane.f32.xlu0 %v240_v26 }
 0x40f   :  { %v269_v27 = vpop.xlane.xlu1 %268 }
 0x410   :  { %v270_v28 = vrot.slane %v269_v27, 4  ;;  %v242_v29 = vpop.xlane.xlu0 %241 }
 0x411   :  { %v243_v30 = vrot.slane %v242_v29, 4 }
 0x412   :  { %v271_v31 = vadd.f32 %v270_v28, %v269_v27 }
 0x413   :  { %v244_v32 = vadd.f32 %v243_v30, %v242_v29 }
 0x414   :  { %v272_v33 = vrot.slane %v271_v31, 2 }
 0x415   :  { %v245_v34 = vrot.slane %v244_v32, 2 }
 0x416   :  { %v273_v35 = vadd.f32 %v272_v33, %v271_v31 }
 0x417   :  { %v246_v36 = vadd.f32 %v245_v34, %v244_v32 }
 0x418   :  { %v274_v37 = vrot.slane %v273_v35, 1 }
 0x419   :  { %v247_v38 = vrot.slane %v246_v36, 1 }
 0x41a   :  { %v275_v39 = vadd.f32 %v274_v37, %v273_v35 }
 0x41b   :  { %v248_v40 = vadd.f32 %v247_v38, %v246_v36 }
 0x41d   :  { %325 = vpush %v248_v40 }
 0x41e   :  { %327 = vpush %v275_v39 }
 0x44e   :  { %s326_s6 = spop %325 }
 0x44f   :  { %s252_s7 = smul.f32 0.125, %s326_s6  ;;  %s328_s8 = spop %327 }
 0x450   :  { %s279_s9 = smul.f32 0.125, %s328_s8 }
 0x452   :  { %s280_s10 = sadd.f32 %s279_s9, %s252_s7 }
 0x454   :  { %s283_s13 = smul.f32 0.5, %s280_s10 }
 0x456   :  { %v284_v41 = vstv %s283_s13 }
 0x457   :  { %286 = vst.msk [vmem:[#allocation12] sm:$0x1] %vm285_vm7, %v284_v41 }
 0x458   :  { %418 = shalt.err (!%p415_p6)
}
 0x459   :  { %s419_s18 = scalar_lea.hbm %s514_s2, 16 }
 0x45a   :  { %p420_p7 = scmp.ne.s32.totalorder %s514_s2, %s419_s18  ;;  %p423_p8 = scmp.lt.u32.totalorder %s419_s18, %s514_s2 }
 0x45c   :  { %p425_p9 = pnand %p423_p8, %p420_p7 }
 0x45e   :  { %428 = shalt.err (!%p425_p9)
}
 0x45f   :  { %296 = dma.vmem_to_hbm [thread:$0]  %s294_s12, 16, %s514_s2, [#allocation9]  }
 0x460   :  { %433 = dma.done.wait [#allocation9], 16  }
 0x461   :  { %434 = vsyncadd [#allocation9], 4294967280 }
 0x462   :  { %300 = vsyncpa [#allocation8], 1 }
 0x463   :  { %301 = vsyncpa [#allocation11], 1 }
 0x464   :  { %302 = vsyncpa [#allocation9], 1 }

</bundles_post_ra>
